<compile_context>
chip_gen: v5e
topology: v5e:2x2
jax: 0.10.0
libtpu: 0.0.40
codegen_flags: <defaults>
</compile_context>

<pallas_src>
import functools

import jax
import jax.numpy as jnp
import numpy as np
from jax import lax
from jax.experimental import pallas as pl
from jax.experimental.pallas import tpu as pltpu

_LANE = 128
_SUBLANE = 8


def _round_up(x, m):
    return ((x + m - 1) // m) * m


# ----------------------------- Pallas kernel ---------------------------------
def _status_predictor_kernel(
    x_ref,       # [T*Bp, D]      bf16  time-major, batch-padded history
    stat_ref,    # [T*Bp, 1]      int32 history_status (padded rows = 0)
    wih_ref,     # [D, GW]        bf16  history->gates weights, gates packed in one 128-lane block
    wst_ref,     # [Sp, GW]       f32   status-embedding rows (one-hot part of w_ih), gate-packed
    whh_ref,     # [H, GW]        bf16  hidden->gates weights, gate-packed
    bconst_ref,  # [1, GW]        f32   b_ih(all gates) + b_hh(r,z), loop-invariant fold
    bhn_ref,     # [1, H]         f32   b_hh(n) (stays inside the r-gated term)
    whead_ref,   # [H, HEADW]     bf16  fused [w_cls | w_reg] head
    bhead_ref,   # [1, HEADW]     f32
    out_ref,     # [Bp, GW+HEADW] f32   [ h (lanes 0:H) | pad | logits | reg | pad ]
    gi_scratch,  # VMEM [T*Bp, GW] f32
):
    TBP = x_ref.shape[0]
    GW = whh_ref.shape[1]          # gate-block width (128): r|z|n at lanes 0 / H / 2H
    H = whh_ref.shape[0]           # real hidden size (3*H <= GW)
    SP = wst_ref.shape[0]
    BP = out_ref.shape[0]
    T = TBP // BP

    # ---- In-kernel status "embedding": one-hot(status) @ w_status (no HBM gic). ----
    lane_ids = lax.broadcasted_iota(jnp.int32, (TBP, SP), 1)
    onehot = (lane_ids == stat_ref[...]).astype(jnp.float32)       # [T*Bp, Sp]

    # ---- Hoisted input projection: all timesteps at once, biases folded in. ----
    gi_scratch[...] = (
        jnp.dot(x_ref[...], wih_ref[...], preferred_element_type=jnp.float32)
        + jnp.dot(onehot, wst_ref[...], preferred_element_type=jnp.float32)
        + bconst_ref[...]
    )

    whh = whh_ref[...]                                    # resident across the unrolled loop
    bhn = jnp.broadcast_to(bhn_ref[...], (BP, H))         # hoisted broadcast (no per-iter bcast)

    def gru_step(t, h):
        row = pl.multiple_of(t * BP, BP)
        gi = gi_scratch[pl.ds(row, BP), :]                # [Bp, GW] f32
        # single-gate-block matmul: one MXU N-pass on the serial critical path
        gh = jnp.dot(h.astype(jnp.bfloat16), whh,
                     preferred_element_type=jnp.float32)  # [Bp, GW] f32
        r = jax.nn.sigmoid(gi[:, 0:H] + gh[:, 0:H])
        z = jax.nn.sigmoid(gi[:, H:2 * H] + gh[:, H:2 * H])
        n = jnp.tanh(gi[:, 2 * H:3 * H] + r * (gh[:, 2 * H:3 * H] + bhn))
        return (1.0 - z) * n + z * h                      # carried h stays f32

    hT = lax.fori_loop(0, T, gru_step, jnp.zeros((BP, H), jnp.float32),
                       unroll=True)

    # ---- Fused output heads: one matmul, lane-dense 128-wide store. ----
    head = (
        jnp.dot(hT.astype(jnp.bfloat16), whead_ref[...],
                preferred_element_type=jnp.float32)
        + bhead_ref[...]
    )                                                     # [Bp, HEADW]
    out_ref[...] = jnp.zeros(out_ref.shape, out_ref.dtype)
    out_ref[:, 0:H] = hT
    out_ref[:, GW:] = head


# ----------------------------- parameter packing ------------------------------
def pack_params(params, *, feat_dim, status_num):
    """Re-lay the 'true' GRU/head params into the gate-block kernel layout."""
    D, S = feat_dim, status_num
    w_ih, w_hh = params["w_ih"], params["w_hh"]
    b_ih, b_hh = params["b_ih"], params["b_hh"]
    H = w_hh.shape[0]
    if 3 * H > _LANE:
        # TODO(synk): fall back to per-gate 128-lane blocks when 3*hidden > 128.
        raise NotImplementedError("single-block gate packing requires 3*hidden <= 128")
    GW = _LANE

    def pack_cols(w):                                      # [K, 3H] -> [K, GW]
        return jnp.pad(w, ((0, 0), (0, GW - 3 * H)))

    wih_hist = pack_cols(w_ih[:D])                         # history part        [D, GW]
    SP = _round_up(S, _SUBLANE)
    w_status = jnp.pad(pack_cols(w_ih[D:]), ((0, SP - S), (0, 0)))   # embedding [Sp, GW]

    whh = pack_cols(w_hh)                                  # [H, GW]
    bih = pack_cols(b_ih)                                  # [1, GW]
    bhh = pack_cols(b_hh)                                  # [1, GW]
    b_const = bih + bhh.at[:, 2 * H:].set(0.0)             # b_ih + b_hh[r,z] (hoisted fold)
    b_hn = bhh[:, 2 * H:3 * H]                             # [1, H]   (stays in the loop)

    w_cls, b_cls = params["w_cls"], params["b_cls"]
    w_reg, b_reg = params["w_reg"], params["b_reg"]
    PD = w_reg.shape[1]
    HEADW = _round_up(max(S + PD, _LANE), _LANE)
    w_head = jnp.zeros((H, HEADW), jnp.float32)
    w_head = w_head.at[:, :S].set(w_cls).at[:, S:S + PD].set(w_reg)
    b_head = jnp.zeros((1, HEADW), jnp.float32)
    b_head = b_head.at[:, :S].set(b_cls).at[:, S:S + PD].set(b_reg)

    return {
        "w_ih_hist": wih_hist.astype(jnp.bfloat16),
        "w_status": w_status,                              # f32: exact embedding add
        "w_hh": whh.astype(jnp.bfloat16),
        "b_const": b_const,
        "b_hn": b_hn,
        "w_head": w_head.astype(jnp.bfloat16),
        "b_head": b_head,
    }


# ----------------------------- JAX wrapper ------------------------------------
@functools.partial(jax.jit, static_argnames=("status_num", "pred_len", "hidden"))
def status_model_forward(history, history_status, packed, *, status_num, pred_len, hidden):
    """history: [B, T, D] f32; history_status: [B, T] int32 in [0, status_num)."""
    B, T, D = history.shape
    S, P, H = status_num, pred_len, hidden
    GW = packed["w_hh"].shape[1]
    HEADW = packed["w_head"].shape[1]
    SP = packed["w_status"].shape[0]
    BP = _round_up(max(B, _SUBLANE), _SUBLANE)

    # Remaining glue is tiny layout plumbing (time-major + sublane batch pad).
    # The status gather / bias fold / gi materialization now live inside the kernel.
    x = jnp.transpose(history, (1, 0, 2))                            # [T, B, D]
    x = jnp.pad(x, ((0, 0), (0, BP - B), (0, 0)))
    x2d = x.reshape(T * BP, D).astype(jnp.bfloat16)

    st = jnp.transpose(history_status.astype(jnp.int32), (1, 0))     # [T, B]
    st = jnp.pad(st, ((0, 0), (0, BP - B))).reshape(T * BP, 1)

    vmem = pl.BlockSpec(memory_space=pltpu.MemorySpace.VMEM)         # whole array, single-buffered

    flops = (2 * T * BP * D * GW            # hoisted history projection
             + 2 * T * BP * SP * GW         # one-hot status projection
             + 2 * T * BP * H * GW          # recurrence h @ W_hh
             + 2 * BP * H * HEADW)          # fused heads
    bytes_accessed = (
        x2d.size * x2d.dtype.itemsize + st.size * st.dtype.itemsize
        + sum(v.size * v.dtype.itemsize for v in packed.values())
        + BP * (GW + HEADW) * 4)

    out = pl.pallas_call(
        _status_predictor_kernel,
        out_shape=jax.ShapeDtypeStruct((BP, GW + HEADW), jnp.float32),
        in_specs=[vmem] * 9,
        out_specs=vmem,
        scratch_shapes=[pltpu.VMEM((T * BP, GW), jnp.float32)],
        cost_estimate=pl.CostEstimate(
            flops=flops,
            transcendentals=3 * T * BP * H,
            bytes_accessed=bytes_accessed),
    )(
        x2d, st,
        packed["w_ih_hist"], packed["w_status"], packed["w_hh"],
        packed["b_const"], packed["b_hn"],
        packed["w_head"], packed["b_head"],
    )

    logits = out[:B, GW:GW + S]
    hidden_out = out[:B, :H]
    regression_output = out[:B, GW + S:GW + S + P * D].reshape(B, P, D)
    return logits, hidden_out, regression_output


# ----------------------------- pure-JAX reference ------------------------------
def _reference_forward(history, history_status, params, *, status_num, pred_len):
    """f32 reference: concat(history, one-hot(status)) -> GRU -> two heads."""
    B, T, D = history.shape
    w_ih, w_hh = params["w_ih"], params["w_hh"]
    b_ih, b_hh = params["b_ih"], params["b_hh"]
    H = w_hh.shape[0]
    onehot = jax.nn.one_hot(history_status, status_num, dtype=jnp.float32)
    x = jnp.concatenate([history, onehot], axis=-1)                  # [B, T, D+S]

    def step(h, xt):
        gi = xt @ w_ih + b_ih
        gh = h @ w_hh + b_hh
        r = jax.nn.sigmoid(gi[:, :H] + gh[:, :H])
        z = jax.nn.sigmoid(gi[:, H:2 * H] + gh[:, H:2 * H])
        n = jnp.tanh(gi[:, 2 * H:] + r * gh[:, 2 * H:])
        return (1.0 - z) * n + z * h, None

    hT, _ = lax.scan(step, jnp.zeros((B, H), jnp.float32),
                     jnp.transpose(x, (1, 0, 2)))
    logits = hT @ params["w_cls"] + params["b_cls"]
    reg = (hT @ params["w_reg"] + params["b_reg"]).reshape(B, pred_len, D)
    return logits, hT, reg


def init_params(key, *, in_dim, hidden, status_num, pred_len, feat_dim):
    """Deterministic synthetic parameter init (GRU + 2 linear heads, 'true' shapes)."""
    ks = jax.random.split(key, 8)
    scale = 0.1
    return {
        "w_ih":  scale * jax.random.normal(ks[0], (in_dim, 3 * hidden), jnp.float32),
        "w_hh":  scale * jax.random.normal(ks[1], (hidden, 3 * hidden), jnp.float32),
        "b_ih":  scale * jax.random.normal(ks[2], (1, 3 * hidden), jnp.float32),
        "b_hh":  scale * jax.random.normal(ks[3], (1, 3 * hidden), jnp.float32),
        "w_cls": scale * jax.random.normal(ks[4], (hidden, status_num), jnp.float32),
        "b_cls": scale * jax.random.normal(ks[5], (1, status_num), jnp.float32),
        "w_reg": scale * jax.random.normal(ks[6], (hidden, pred_len * feat_dim), jnp.float32),
        "b_reg": scale * jax.random.normal(ks[7], (1, pred_len * feat_dim), jnp.float32),
    }


if __name__ == "__main__":
    # Small shapes consistent with the module's forward(history, history_status)
    B, T, D = 2, 8, 16          # batch, history length, feature dim
    STATUS_NUM = 4              # status classes
    PRED_LEN = 4                # config.pred_len
    HIDDEN = 32                 # GRU hidden size

    key = jax.random.PRNGKey(0)
    k_hist, k_stat, k_param = jax.random.split(key, 3)

    history = jax.random.normal(k_hist, (B, T, D), jnp.float32)
    history_status = jax.random.randint(k_stat, (B, T), 0, STATUS_NUM, jnp.int32)

    params = init_params(
        k_param,
        in_dim=D + STATUS_NUM,
        hidden=HIDDEN,
        status_num=STATUS_NUM,
        pred_len=PRED_LEN,
        feat_dim=D,
    )
    packed = pack_params(params, feat_dim=D, status_num=STATUS_NUM)

    outputs, hidden, regression_output = status_model_forward(
        history, history_status, packed,
        status_num=STATUS_NUM, pred_len=PRED_LEN, hidden=HIDDEN,
    )
    jax.block_until_ready((outputs, hidden, regression_output))

    assert outputs.shape == (B, STATUS_NUM)
    assert hidden.shape == (B, HIDDEN)
    assert regression_output.shape == (B, PRED_LEN, D)

    # Correctness vs. the pure-JAX f32 reference (bf16 MXU operands -> loose tol).
    ref_logits, ref_hidden, ref_reg = _reference_forward(
        history, history_status, params, status_num=STATUS_NUM, pred_len=PRED_LEN)
    np.testing.assert_allclose(np.asarray(outputs), np.asarray(ref_logits),
                               rtol=3e-2, atol=3e-2)
    np.testing.assert_allclose(np.asarray(hidden), np.asarray(ref_hidden),
                               rtol=3e-2, atol=3e-2)
    np.testing.assert_allclose(np.asarray(regression_output), np.asarray(ref_reg),
                               rtol=3e-2, atol=3e-2)

    print("KERNEL_OK")
</pallas_src>

<mosaic_0001>
module attributes {stable_mosaic.version = 11 : i64} {
  func.func @_status_predictor_kernel(%arg0: memref<64x16xbf16, #tpu.memory_space<vmem>>, %arg1: memref<64x1xi32, #tpu.memory_space<vmem>>, %arg2: memref<16x128xbf16, #tpu.memory_space<vmem>>, %arg3: memref<8x128xf32, #tpu.memory_space<vmem>>, %arg4: memref<32x128xbf16, #tpu.memory_space<vmem>>, %arg5: memref<1x128xf32, #tpu.memory_space<vmem>>, %arg6: memref<1x32xf32, #tpu.memory_space<vmem>>, %arg7: memref<32x128xbf16, #tpu.memory_space<vmem>>, %arg8: memref<1x128xf32, #tpu.memory_space<vmem>>, %arg9: memref<8x256xf32, #tpu.memory_space<vmem>>, %arg10: memref<64x128xf32, #tpu.memory_space<vmem>>) attributes {dimension_semantics = [], scalar_prefetch = 0 : i64, scratch_operands = 1 : i64, tpu.core_type = #tpu.core_type<tc>} {
    %0 = tpu.iota {dimensions = array<i32: 1>} : vector<64x8xi32>
    %c0 = arith.constant 0 : index
    %c0_0 = arith.constant 0 : index
    %1 = vector.load %arg1[%c0, %c0_0] : memref<64x1xi32, #tpu.memory_space<vmem>>, vector<64x1xi32>
    %2 = vector.broadcast %1 : vector<64x1xi32> to vector<64x8xi32>
    %3 = arith.cmpi eq, %0, %2 : vector<64x8xi32>
    %4 = arith.extui %3 : vector<64x8xi1> to vector<64x8xi32>
    %5 = arith.sitofp %4 : vector<64x8xi32> to vector<64x8xf32>
    %c0_1 = arith.constant 0 : index
    %c0_2 = arith.constant 0 : index
    %6 = vector.load %arg0[%c0_1, %c0_2] : memref<64x16xbf16, #tpu.memory_space<vmem>>, vector<64x16xbf16>
    %c0_3 = arith.constant 0 : index
    %c0_4 = arith.constant 0 : index
    %7 = vector.load %arg2[%c0_3, %c0_4] : memref<16x128xbf16, #tpu.memory_space<vmem>>, vector<16x128xbf16>
    %cst = arith.constant dense<0.000000e+00> : vector<64x128xf32>
    %8 = tpu.matmul %6, %7, %cst {dimension_numbers = #tpu.dot_dimension_numbers<[1], [0], [0], [1], [0, 0, 1, 1], [], []>} : vector<64x16xbf16>, vector<16x128xbf16>, vector<64x128xf32> -> vector<64x128xf32>
    %c0_5 = arith.constant 0 : index
    %c0_6 = arith.constant 0 : index
    %9 = vector.load %arg3[%c0_5, %c0_6] : memref<8x128xf32, #tpu.memory_space<vmem>>, vector<8x128xf32>
    %cst_7 = arith.constant dense<0.000000e+00> : vector<64x128xf32>
    %10 = tpu.matmul %5, %9, %cst_7 {dimension_numbers = #tpu.dot_dimension_numbers<[1], [0], [0], [1], [0, 0, 1, 1], [], []>} : vector<64x8xf32>, vector<8x128xf32>, vector<64x128xf32> -> vector<64x128xf32>
    %11 = arith.addf %8, %10 : vector<64x128xf32>
    %c0_8 = arith.constant 0 : index
    %c0_9 = arith.constant 0 : index
    %12 = vector.load %arg5[%c0_8, %c0_9] : memref<1x128xf32, #tpu.memory_space<vmem>>, vector<1x128xf32>
    %13 = vector.broadcast %12 : vector<1x128xf32> to vector<64x128xf32>
    %14 = arith.addf %11, %13 : vector<64x128xf32>
    %c0_10 = arith.constant 0 : index
    %c0_11 = arith.constant 0 : index
    %15 = vector.load %arg10[%c0_10, %c0_11] : memref<64x128xf32, #tpu.memory_space<vmem>>, vector<64x128xf32>
    tpu.vector_store %arg10[%c0_10, %c0_11], %14 {strides = array<i32>} : memref<64x128xf32, #tpu.memory_space<vmem>>, vector<64x128xf32>,
    %c0_12 = arith.constant 0 : index
    %c0_13 = arith.constant 0 : index
    %16 = vector.load %arg4[%c0_12, %c0_13] : memref<32x128xbf16, #tpu.memory_space<vmem>>, vector<32x128xbf16>
    %c0_14 = arith.constant 0 : index
    %c0_15 = arith.constant 0 : index
    %17 = vector.load %arg6[%c0_14, %c0_15] : memref<1x32xf32, #tpu.memory_space<vmem>>, vector<1x32xf32>
    %18 = vector.shape_cast %17 : vector<1x32xf32> to vector<1x32xf32>
    %19 = vector.broadcast %18 : vector<1x32xf32> to vector<8x32xf32>
    %cst_16 = arith.constant 0.000000e+00 : f32
    %20 = vector.broadcast %cst_16 : f32 to vector<8x32xf32>
    %c0_i32 = arith.constant 0 : i32
    %c8_i32 = arith.constant 8 : i32
    %21 = arith.muli %c0_i32, %c8_i32 : i32
    %22 = tpu.assume_multiple %21, 8 : i32
    %23 = arith.index_cast %22 : i32 to index
    %c0_17 = arith.constant 0 : index
    %24 = vector.load %arg10[%23, %c0_17] : memref<64x128xf32, #tpu.memory_space<vmem>>, vector<8x128xf32>
    %25 = arith.truncf %20 : vector<8x32xf32> to vector<8x32xbf16>
    %cst_18 = arith.constant dense<0.000000e+00> : vector<8x128xf32>
    %26 = tpu.matmul %25, %16, %cst_18 {dimension_numbers = #tpu.dot_dimension_numbers<[1], [0], [0], [1], [0, 0, 1, 1], [], []>} : vector<8x32xbf16>, vector<32x128xbf16>, vector<8x128xf32> -> vector<8x128xf32>
    %27 = vector.extract_strided_slice %24 {offsets = [0, 0], sizes = [8, 32], strides = [1, 1]} : vector<8x128xf32> to vector<8x32xf32>
    %28 = vector.extract_strided_slice %26 {offsets = [0, 0], sizes = [8, 32], strides = [1, 1]} : vector<8x128xf32> to vector<8x32xf32>
    %29 = arith.addf %27, %28 : vector<8x32xf32>
    %30 = arith.negf %29 : vector<8x32xf32>
    %31 = math.exp %30 : vector<8x32xf32>
    %cst_19 = arith.constant 1.000000e+00 : f32
    %32 = vector.broadcast %cst_19 : f32 to vector<8x32xf32>
    %33 = arith.addf %32, %31 : vector<8x32xf32>
    %34 = arith.divf %32, %33 : vector<8x32xf32>
    %35 = vector.extract_strided_slice %24 {offsets = [0, 32], sizes = [8, 32], strides = [1, 1]} : vector<8x128xf32> to vector<8x32xf32>
    %36 = vector.extract_strided_slice %26 {offsets = [0, 32], sizes = [8, 32], strides = [1, 1]} : vector<8x128xf32> to vector<8x32xf32>
    %37 = arith.addf %35, %36 : vector<8x32xf32>
    %38 = arith.negf %37 : vector<8x32xf32>
    %39 = math.exp %38 : vector<8x32xf32>
    %cst_20 = arith.constant 1.000000e+00 : f32
    %40 = vector.broadcast %cst_20 : f32 to vector<8x32xf32>
    %41 = arith.addf %40, %39 : vector<8x32xf32>
    %42 = arith.divf %40, %41 : vector<8x32xf32>
    %43 = vector.extract_strided_slice %24 {offsets = [0, 64], sizes = [8, 32], strides = [1, 1]} : vector<8x128xf32> to vector<8x32xf32>
    %44 = vector.extract_strided_slice %26 {offsets = [0, 64], sizes = [8, 32], strides = [1, 1]} : vector<8x128xf32> to vector<8x32xf32>
    %45 = arith.addf %44, %19 : vector<8x32xf32>
    %46 = arith.mulf %34, %45 : vector<8x32xf32>
    %47 = arith.addf %43, %46 : vector<8x32xf32>
    %48 = math.tanh %47 : vector<8x32xf32>
    %cst_21 = arith.constant 1.000000e+00 : f32
    %49 = vector.broadcast %cst_21 : f32 to vector<8x32xf32>
    %50 = arith.subf %49, %42 : vector<8x32xf32>
    %51 = arith.mulf %50, %48 : vector<8x32xf32>
    %52 = arith.mulf %42, %20 : vector<8x32xf32>
    %53 = arith.addf %51, %52 : vector<8x32xf32>
    %c1_i32 = arith.constant 1 : i32
    %c8_i32_22 = arith.constant 8 : i32
    %54 = arith.muli %c1_i32, %c8_i32_22 : i32
    %55 = tpu.assume_multiple %54, 8 : i32
    %56 = arith.index_cast %55 : i32 to index
    %c0_23 = arith.constant 0 : index
    %57 = vector.load %arg10[%56, %c0_23] : memref<64x128xf32, #tpu.memory_space<vmem>>, vector<8x128xf32>
    %58 = arith.truncf %53 : vector<8x32xf32> to vector<8x32xbf16>
    %cst_24 = arith.constant dense<0.000000e+00> : vector<8x128xf32>
    %59 = tpu.matmul %58, %16, %cst_24 {dimension_numbers = #tpu.dot_dimension_numbers<[1], [0], [0], [1], [0, 0, 1, 1], [], []>} : vector<8x32xbf16>, vector<32x128xbf16>, vector<8x128xf32> -> vector<8x128xf32>
    %60 = vector.extract_strided_slice %57 {offsets = [0, 0], sizes = [8, 32], strides = [1, 1]} : vector<8x128xf32> to vector<8x32xf32>
    %61 = vector.extract_strided_slice %59 {offsets = [0, 0], sizes = [8, 32], strides = [1, 1]} : vector<8x128xf32> to vector<8x32xf32>
    %62 = arith.addf %60, %61 : vector<8x32xf32>
    %63 = arith.negf %62 : vector<8x32xf32>
    %64 = math.exp %63 : vector<8x32xf32>
    %cst_25 = arith.constant 1.000000e+00 : f32
    %65 = vector.broadcast %cst_25 : f32 to vector<8x32xf32>
    %66 = arith.addf %65, %64 : vector<8x32xf32>
    %67 = arith.divf %65, %66 : vector<8x32xf32>
    %68 = vector.extract_strided_slice %57 {offsets = [0, 32], sizes = [8, 32], strides = [1, 1]} : vector<8x128xf32> to vector<8x32xf32>
    %69 = vector.extract_strided_slice %59 {offsets = [0, 32], sizes = [8, 32], strides = [1, 1]} : vector<8x128xf32> to vector<8x32xf32>
    %70 = arith.addf %68, %69 : vector<8x32xf32>
    %71 = arith.negf %70 : vector<8x32xf32>
    %72 = math.exp %71 : vector<8x32xf32>
    %cst_26 = arith.constant 1.000000e+00 : f32
    %73 = vector.broadcast %cst_26 : f32 to vector<8x32xf32>
    %74 = arith.addf %73, %72 : vector<8x32xf32>
    %75 = arith.divf %73, %74 : vector<8x32xf32>
    %76 = vector.extract_strided_slice %57 {offsets = [0, 64], sizes = [8, 32], strides = [1, 1]} : vector<8x128xf32> to vector<8x32xf32>
    %77 = vector.extract_strided_slice %59 {offsets = [0, 64], sizes = [8, 32], strides = [1, 1]} : vector<8x128xf32> to vector<8x32xf32>
    %78 = arith.addf %77, %19 : vector<8x32xf32>
    %79 = arith.mulf %67, %78 : vector<8x32xf32>
    %80 = arith.addf %76, %79 : vector<8x32xf32>
    %81 = math.tanh %80 : vector<8x32xf32>
    %cst_27 = arith.constant 1.000000e+00 : f32
    %82 = vector.broadcast %cst_27 : f32 to vector<8x32xf32>
    %83 = arith.subf %82, %75 : vector<8x32xf32>
    %84 = arith.mulf %83, %81 : vector<8x32xf32>
    %85 = arith.mulf %75, %53 : vector<8x32xf32>
    %86 = arith.addf %84, %85 : vector<8x32xf32>
    %c2_i32 = arith.constant 2 : i32
    %c8_i32_28 = arith.constant 8 : i32
    %87 = arith.muli %c2_i32, %c8_i32_28 : i32
    %88 = tpu.assume_multiple %87, 8 : i32
    %89 = arith.index_cast %88 : i32 to index
    %c0_29 = arith.constant 0 : index
    %90 = vector.load %arg10[%89, %c0_29] : memref<64x128xf32, #tpu.memory_space<vmem>>, vector<8x128xf32>
    %91 = arith.truncf %86 : vector<8x32xf32> to vector<8x32xbf16>
    %cst_30 = arith.constant dense<0.000000e+00> : vector<8x128xf32>
    %92 = tpu.matmul %91, %16, %cst_30 {dimension_numbers = #tpu.dot_dimension_numbers<[1], [0], [0], [1], [0, 0, 1, 1], [], []>} : vector<8x32xbf16>, vector<32x128xbf16>, vector<8x128xf32> -> vector<8x128xf32>
    %93 = vector.extract_strided_slice %90 {offsets = [0, 0], sizes = [8, 32], strides = [1, 1]} : vector<8x128xf32> to vector<8x32xf32>
    %94 = vector.extract_strided_slice %92 {offsets = [0, 0], sizes = [8, 32], strides = [1, 1]} : vector<8x128xf32> to vector<8x32xf32>
    %95 = arith.addf %93, %94 : vector<8x32xf32>
    %96 = arith.negf %95 : vector<8x32xf32>
    %97 = math.exp %96 : vector<8x32xf32>
    %cst_31 = arith.constant 1.000000e+00 : f32
    %98 = vector.broadcast %cst_31 : f32 to vector<8x32xf32>
    %99 = arith.addf %98, %97 : vector<8x32xf32>
    %100 = arith.divf %98, %99 : vector<8x32xf32>
    %101 = vector.extract_strided_slice %90 {offsets = [0, 32], sizes = [8, 32], strides = [1, 1]} : vector<8x128xf32> to vector<8x32xf32>
    %102 = vector.extract_strided_slice %92 {offsets = [0, 32], sizes = [8, 32], strides = [1, 1]} : vector<8x128xf32> to vector<8x32xf32>
    %103 = arith.addf %101, %102 : vector<8x32xf32>
    %104 = arith.negf %103 : vector<8x32xf32>
    %105 = math.exp %104 : vector<8x32xf32>
    %cst_32 = arith.constant 1.000000e+00 : f32
    %106 = vector.broadcast %cst_32 : f32 to vector<8x32xf32>
    %107 = arith.addf %106, %105 : vector<8x32xf32>
    %108 = arith.divf %106, %107 : vector<8x32xf32>
    %109 = vector.extract_strided_slice %90 {offsets = [0, 64], sizes = [8, 32], strides = [1, 1]} : vector<8x128xf32> to vector<8x32xf32>
    %110 = vector.extract_strided_slice %92 {offsets = [0, 64], sizes = [8, 32], strides = [1, 1]} : vector<8x128xf32> to vector<8x32xf32>
    %111 = arith.addf %110, %19 : vector<8x32xf32>
    %112 = arith.mulf %100, %111 : vector<8x32xf32>
    %113 = arith.addf %109, %112 : vector<8x32xf32>
    %114 = math.tanh %113 : vector<8x32xf32>
    %cst_33 = arith.constant 1.000000e+00 : f32
    %115 = vector.broadcast %cst_33 : f32 to vector<8x32xf32>
    %116 = arith.subf %115, %108 : vector<8x32xf32>
    %117 = arith.mulf %116, %114 : vector<8x32xf32>
    %118 = arith.mulf %108, %86 : vector<8x32xf32>
    %119 = arith.addf %117, %118 : vector<8x32xf32>
    %c3_i32 = arith.constant 3 : i32
    %c8_i32_34 = arith.constant 8 : i32
    %120 = arith.muli %c3_i32, %c8_i32_34 : i32
    %121 = tpu.assume_multiple %120, 8 : i32
    %122 = arith.index_cast %121 : i32 to index
    %c0_35 = arith.constant 0 : index
    %123 = vector.load %arg10[%122, %c0_35] : memref<64x128xf32, #tpu.memory_space<vmem>>, vector<8x128xf32>
    %124 = arith.truncf %119 : vector<8x32xf32> to vector<8x32xbf16>
    %cst_36 = arith.constant dense<0.000000e+00> : vector<8x128xf32>
    %125 = tpu.matmul %124, %16, %cst_36 {dimension_numbers = #tpu.dot_dimension_numbers<[1], [0], [0], [1], [0, 0, 1, 1], [], []>} : vector<8x32xbf16>, vector<32x128xbf16>, vector<8x128xf32> -> vector<8x128xf32>
    %126 = vector.extract_strided_slice %123 {offsets = [0, 0], sizes = [8, 32], strides = [1, 1]} : vector<8x128xf32> to vector<8x32xf32>
    %127 = vector.extract_strided_slice %125 {offsets = [0, 0], sizes = [8, 32], strides = [1, 1]} : vector<8x128xf32> to vector<8x32xf32>
    %128 = arith.addf %126, %127 : vector<8x32xf32>
    %129 = arith.negf %128 : vector<8x32xf32>
    %130 = math.exp %129 : vector<8x32xf32>
    %cst_37 = arith.constant 1.000000e+00 : f32
    %131 = vector.broadcast %cst_37 : f32 to vector<8x32xf32>
    %132 = arith.addf %131, %130 : vector<8x32xf32>
    %133 = arith.divf %131, %132 : vector<8x32xf32>
    %134 = vector.extract_strided_slice %123 {offsets = [0, 32], sizes = [8, 32], strides = [1, 1]} : vector<8x128xf32> to vector<8x32xf32>
    %135 = vector.extract_strided_slice %125 {offsets = [0, 32], sizes = [8, 32], strides = [1, 1]} : vector<8x128xf32> to vector<8x32xf32>
    %136 = arith.addf %134, %135 : vector<8x32xf32>
    %137 = arith.negf %136 : vector<8x32xf32>
    %138 = math.exp %137 : vector<8x32xf32>
    %cst_38 = arith.constant 1.000000e+00 : f32
    %139 = vector.broadcast %cst_38 : f32 to vector<8x32xf32>
    %140 = arith.addf %139, %138 : vector<8x32xf32>
    %141 = arith.divf %139, %140 : vector<8x32xf32>
    %142 = vector.extract_strided_slice %123 {offsets = [0, 64], sizes = [8, 32], strides = [1, 1]} : vector<8x128xf32> to vector<8x32xf32>
    %143 = vector.extract_strided_slice %125 {offsets = [0, 64], sizes = [8, 32], strides = [1, 1]} : vector<8x128xf32> to vector<8x32xf32>
    %144 = arith.addf %143, %19 : vector<8x32xf32>
    %145 = arith.mulf %133, %144 : vector<8x32xf32>
    %146 = arith.addf %142, %145 : vector<8x32xf32>
    %147 = math.tanh %146 : vector<8x32xf32>
    %cst_39 = arith.constant 1.000000e+00 : f32
    %148 = vector.broadcast %cst_39 : f32 to vector<8x32xf32>
    %149 = arith.subf %148, %141 : vector<8x32xf32>
    %150 = arith.mulf %149, %147 : vector<8x32xf32>
    %151 = arith.mulf %141, %119 : vector<8x32xf32>
    %152 = arith.addf %150, %151 : vector<8x32xf32>
    %c4_i32 = arith.constant 4 : i32
    %c8_i32_40 = arith.constant 8 : i32
    %153 = arith.muli %c4_i32, %c8_i32_40 : i32
    %154 = tpu.assume_multiple %153, 8 : i32
    %155 = arith.index_cast %154 : i32 to index
    %c0_41 = arith.constant 0 : index
    %156 = vector.load %arg10[%155, %c0_41] : memref<64x128xf32, #tpu.memory_space<vmem>>, vector<8x128xf32>
    %157 = arith.truncf %152 : vector<8x32xf32> to vector<8x32xbf16>
    %cst_42 = arith.constant dense<0.000000e+00> : vector<8x128xf32>
    %158 = tpu.matmul %157, %16, %cst_42 {dimension_numbers = #tpu.dot_dimension_numbers<[1], [0], [0], [1], [0, 0, 1, 1], [], []>} : vector<8x32xbf16>, vector<32x128xbf16>, vector<8x128xf32> -> vector<8x128xf32>
    %159 = vector.extract_strided_slice %156 {offsets = [0, 0], sizes = [8, 32], strides = [1, 1]} : vector<8x128xf32> to vector<8x32xf32>
    %160 = vector.extract_strided_slice %158 {offsets = [0, 0], sizes = [8, 32], strides = [1, 1]} : vector<8x128xf32> to vector<8x32xf32>
    %161 = arith.addf %159, %160 : vector<8x32xf32>
    %162 = arith.negf %161 : vector<8x32xf32>
    %163 = math.exp %162 : vector<8x32xf32>
    %cst_43 = arith.constant 1.000000e+00 : f32
    %164 = vector.broadcast %cst_43 : f32 to vector<8x32xf32>
    %165 = arith.addf %164, %163 : vector<8x32xf32>
    %166 = arith.divf %164, %165 : vector<8x32xf32>
    %167 = vector.extract_strided_slice %156 {offsets = [0, 32], sizes = [8, 32], strides = [1, 1]} : vector<8x128xf32> to vector<8x32xf32>
    %168 = vector.extract_strided_slice %158 {offsets = [0, 32], sizes = [8, 32], strides = [1, 1]} : vector<8x128xf32> to vector<8x32xf32>
    %169 = arith.addf %167, %168 : vector<8x32xf32>
    %170 = arith.negf %169 : vector<8x32xf32>
    %171 = math.exp %170 : vector<8x32xf32>
    %cst_44 = arith.constant 1.000000e+00 : f32
    %172 = vector.broadcast %cst_44 : f32 to vector<8x32xf32>
    %173 = arith.addf %172, %171 : vector<8x32xf32>
    %174 = arith.divf %172, %173 : vector<8x32xf32>
    %175 = vector.extract_strided_slice %156 {offsets = [0, 64], sizes = [8, 32], strides = [1, 1]} : vector<8x128xf32> to vector<8x32xf32>
    %176 = vector.extract_strided_slice %158 {offsets = [0, 64], sizes = [8, 32], strides = [1, 1]} : vector<8x128xf32> to vector<8x32xf32>
    %177 = arith.addf %176, %19 : vector<8x32xf32>
    %178 = arith.mulf %166, %177 : vector<8x32xf32>
    %179 = arith.addf %175, %178 : vector<8x32xf32>
    %180 = math.tanh %179 : vector<8x32xf32>
    %cst_45 = arith.constant 1.000000e+00 : f32
    %181 = vector.broadcast %cst_45 : f32 to vector<8x32xf32>
    %182 = arith.subf %181, %174 : vector<8x32xf32>
    %183 = arith.mulf %182, %180 : vector<8x32xf32>
    %184 = arith.mulf %174, %152 : vector<8x32xf32>
    %185 = arith.addf %183, %184 : vector<8x32xf32>
    %c5_i32 = arith.constant 5 : i32
    %c8_i32_46 = arith.constant 8 : i32
    %186 = arith.muli %c5_i32, %c8_i32_46 : i32
    %187 = tpu.assume_multiple %186, 8 : i32
    %188 = arith.index_cast %187 : i32 to index
    %c0_47 = arith.constant 0 : index
    %189 = vector.load %arg10[%188, %c0_47] : memref<64x128xf32, #tpu.memory_space<vmem>>, vector<8x128xf32>
    %190 = arith.truncf %185 : vector<8x32xf32> to vector<8x32xbf16>
    %cst_48 = arith.constant dense<0.000000e+00> : vector<8x128xf32>
    %191 = tpu.matmul %190, %16, %cst_48 {dimension_numbers = #tpu.dot_dimension_numbers<[1], [0], [0], [1], [0, 0, 1, 1], [], []>} : vector<8x32xbf16>, vector<32x128xbf16>, vector<8x128xf32> -> vector<8x128xf32>
    %192 = vector.extract_strided_slice %189 {offsets = [0, 0], sizes = [8, 32], strides = [1, 1]} : vector<8x128xf32> to vector<8x32xf32>
    %193 = vector.extract_strided_slice %191 {offsets = [0, 0], sizes = [8, 32], strides = [1, 1]} : vector<8x128xf32> to vector<8x32xf32>
    %194 = arith.addf %192, %193 : vector<8x32xf32>
    %195 = arith.negf %194 : vector<8x32xf32>
    %196 = math.exp %195 : vector<8x32xf32>
    %cst_49 = arith.constant 1.000000e+00 : f32
    %197 = vector.broadcast %cst_49 : f32 to vector<8x32xf32>
    %198 = arith.addf %197, %196 : vector<8x32xf32>
    %199 = arith.divf %197, %198 : vector<8x32xf32>
    %200 = vector.extract_strided_slice %189 {offsets = [0, 32], sizes = [8, 32], strides = [1, 1]} : vector<8x128xf32> to vector<8x32xf32>
    %201 = vector.extract_strided_slice %191 {offsets = [0, 32], sizes = [8, 32], strides = [1, 1]} : vector<8x128xf32> to vector<8x32xf32>
    %202 = arith.addf %200, %201 : vector<8x32xf32>
    %203 = arith.negf %202 : vector<8x32xf32>
    %204 = math.exp %203 : vector<8x32xf32>
    %cst_50 = arith.constant 1.000000e+00 : f32
    %205 = vector.broadcast %cst_50 : f32 to vector<8x32xf32>
    %206 = arith.addf %205, %204 : vector<8x32xf32>
    %207 = arith.divf %205, %206 : vector<8x32xf32>
    %208 = vector.extract_strided_slice %189 {offsets = [0, 64], sizes = [8, 32], strides = [1, 1]} : vector<8x128xf32> to vector<8x32xf32>
    %209 = vector.extract_strided_slice %191 {offsets = [0, 64], sizes = [8, 32], strides = [1, 1]} : vector<8x128xf32> to vector<8x32xf32>
    %210 = arith.addf %209, %19 : vector<8x32xf32>
    %211 = arith.mulf %199, %210 : vector<8x32xf32>
    %212 = arith.addf %208, %211 : vector<8x32xf32>
    %213 = math.tanh %212 : vector<8x32xf32>
    %cst_51 = arith.constant 1.000000e+00 : f32
    %214 = vector.broadcast %cst_51 : f32 to vector<8x32xf32>
    %215 = arith.subf %214, %207 : vector<8x32xf32>
    %216 = arith.mulf %215, %213 : vector<8x32xf32>
    %217 = arith.mulf %207, %185 : vector<8x32xf32>
    %218 = arith.addf %216, %217 : vector<8x32xf32>
    %c6_i32 = arith.constant 6 : i32
    %c8_i32_52 = arith.constant 8 : i32
    %219 = arith.muli %c6_i32, %c8_i32_52 : i32
    %220 = tpu.assume_multiple %219, 8 : i32
    %221 = arith.index_cast %220 : i32 to index
    %c0_53 = arith.constant 0 : index
    %222 = vector.load %arg10[%221, %c0_53] : memref<64x128xf32, #tpu.memory_space<vmem>>, vector<8x128xf32>
    %223 = arith.truncf %218 : vector<8x32xf32> to vector<8x32xbf16>
    %cst_54 = arith.constant dense<0.000000e+00> : vector<8x128xf32>
    %224 = tpu.matmul %223, %16, %cst_54 {dimension_numbers = #tpu.dot_dimension_numbers<[1], [0], [0], [1], [0, 0, 1, 1], [], []>} : vector<8x32xbf16>, vector<32x128xbf16>, vector<8x128xf32> -> vector<8x128xf32>
    %225 = vector.extract_strided_slice %222 {offsets = [0, 0], sizes = [8, 32], strides = [1, 1]} : vector<8x128xf32> to vector<8x32xf32>
    %226 = vector.extract_strided_slice %224 {offsets = [0, 0], sizes = [8, 32], strides = [1, 1]} : vector<8x128xf32> to vector<8x32xf32>
    %227 = arith.addf %225, %226 : vector<8x32xf32>
    %228 = arith.negf %227 : vector<8x32xf32>
    %229 = math.exp %228 : vector<8x32xf32>
    %cst_55 = arith.constant 1.000000e+00 : f32
    %230 = vector.broadcast %cst_55 : f32 to vector<8x32xf32>
    %231 = arith.addf %230, %229 : vector<8x32xf32>
    %232 = arith.divf %230, %231 : vector<8x32xf32>
    %233 = vector.extract_strided_slice %222 {offsets = [0, 32], sizes = [8, 32], strides = [1, 1]} : vector<8x128xf32> to vector<8x32xf32>
    %234 = vector.extract_strided_slice %224 {offsets = [0, 32], sizes = [8, 32], strides = [1, 1]} : vector<8x128xf32> to vector<8x32xf32>
    %235 = arith.addf %233, %234 : vector<8x32xf32>
    %236 = arith.negf %235 : vector<8x32xf32>
    %237 = math.exp %236 : vector<8x32xf32>
    %cst_56 = arith.constant 1.000000e+00 : f32
    %238 = vector.broadcast %cst_56 : f32 to vector<8x32xf32>
    %239 = arith.addf %238, %237 : vector<8x32xf32>
    %240 = arith.divf %238, %239 : vector<8x32xf32>
    %241 = vector.extract_strided_slice %222 {offsets = [0, 64], sizes = [8, 32], strides = [1, 1]} : vector<8x128xf32> to vector<8x32xf32>
    %242 = vector.extract_strided_slice %224 {offsets = [0, 64], sizes = [8, 32], strides = [1, 1]} : vector<8x128xf32> to vector<8x32xf32>
    %243 = arith.addf %242, %19 : vector<8x32xf32>
    %244 = arith.mulf %232, %243 : vector<8x32xf32>
    %245 = arith.addf %241, %244 : vector<8x32xf32>
    %246 = math.tanh %245 : vector<8x32xf32>
    %cst_57 = arith.constant 1.000000e+00 : f32
    %247 = vector.broadcast %cst_57 : f32 to vector<8x32xf32>
    %248 = arith.subf %247, %240 : vector<8x32xf32>
    %249 = arith.mulf %248, %246 : vector<8x32xf32>
    %250 = arith.mulf %240, %218 : vector<8x32xf32>
    %251 = arith.addf %249, %250 : vector<8x32xf32>
    %c7_i32 = arith.constant 7 : i32
    %c8_i32_58 = arith.constant 8 : i32
    %252 = arith.muli %c7_i32, %c8_i32_58 : i32
    %253 = tpu.assume_multiple %252, 8 : i32
    %254 = arith.index_cast %253 : i32 to index
    %c0_59 = arith.constant 0 : index
    %255 = vector.load %arg10[%254, %c0_59] : memref<64x128xf32, #tpu.memory_space<vmem>>, vector<8x128xf32>
    %256 = arith.truncf %251 : vector<8x32xf32> to vector<8x32xbf16>
    %cst_60 = arith.constant dense<0.000000e+00> : vector<8x128xf32>
    %257 = tpu.matmul %256, %16, %cst_60 {dimension_numbers = #tpu.dot_dimension_numbers<[1], [0], [0], [1], [0, 0, 1, 1], [], []>} : vector<8x32xbf16>, vector<32x128xbf16>, vector<8x128xf32> -> vector<8x128xf32>
    %258 = vector.extract_strided_slice %255 {offsets = [0, 0], sizes = [8, 32], strides = [1, 1]} : vector<8x128xf32> to vector<8x32xf32>
    %259 = vector.extract_strided_slice %257 {offsets = [0, 0], sizes = [8, 32], strides = [1, 1]} : vector<8x128xf32> to vector<8x32xf32>
    %260 = arith.addf %258, %259 : vector<8x32xf32>
    %261 = arith.negf %260 : vector<8x32xf32>
    %262 = math.exp %261 : vector<8x32xf32>
    %cst_61 = arith.constant 1.000000e+00 : f32
    %263 = vector.broadcast %cst_61 : f32 to vector<8x32xf32>
    %264 = arith.addf %263, %262 : vector<8x32xf32>
    %265 = arith.divf %263, %264 : vector<8x32xf32>
    %266 = vector.extract_strided_slice %255 {offsets = [0, 32], sizes = [8, 32], strides = [1, 1]} : vector<8x128xf32> to vector<8x32xf32>
    %267 = vector.extract_strided_slice %257 {offsets = [0, 32], sizes = [8, 32], strides = [1, 1]} : vector<8x128xf32> to vector<8x32xf32>
    %268 = arith.addf %266, %267 : vector<8x32xf32>
    %269 = arith.negf %268 : vector<8x32xf32>
    %270 = math.exp %269 : vector<8x32xf32>
    %cst_62 = arith.constant 1.000000e+00 : f32
    %271 = vector.broadcast %cst_62 : f32 to vector<8x32xf32>
    %272 = arith.addf %271, %270 : vector<8x32xf32>
    %273 = arith.divf %271, %272 : vector<8x32xf32>
    %274 = vector.extract_strided_slice %255 {offsets = [0, 64], sizes = [8, 32], strides = [1, 1]} : vector<8x128xf32> to vector<8x32xf32>
    %275 = vector.extract_strided_slice %257 {offsets = [0, 64], sizes = [8, 32], strides = [1, 1]} : vector<8x128xf32> to vector<8x32xf32>
    %276 = arith.addf %275, %19 : vector<8x32xf32>
    %277 = arith.mulf %265, %276 : vector<8x32xf32>
    %278 = arith.addf %274, %277 : vector<8x32xf32>
    %279 = math.tanh %278 : vector<8x32xf32>
    %cst_63 = arith.constant 1.000000e+00 : f32
    %280 = vector.broadcast %cst_63 : f32 to vector<8x32xf32>
    %281 = arith.subf %280, %273 : vector<8x32xf32>
    %282 = arith.mulf %281, %279 : vector<8x32xf32>
    %283 = arith.mulf %273, %251 : vector<8x32xf32>
    %284 = arith.addf %282, %283 : vector<8x32xf32>
    %c8_i32_64 = arith.constant 8 : i32
    %285 = arith.truncf %284 : vector<8x32xf32> to vector<8x32xbf16>
    %c0_65 = arith.constant 0 : index
    %c0_66 = arith.constant 0 : index
    %286 = vector.load %arg7[%c0_65, %c0_66] : memref<32x128xbf16, #tpu.memory_space<vmem>>, vector<32x128xbf16>
    %cst_67 = arith.constant dense<0.000000e+00> : vector<8x128xf32>
    %287 = tpu.matmul %285, %286, %cst_67 {dimension_numbers = #tpu.dot_dimension_numbers<[1], [0], [0], [1], [0, 0, 1, 1], [], []>} : vector<8x32xbf16>, vector<32x128xbf16>, vector<8x128xf32> -> vector<8x128xf32>
    %c0_68 = arith.constant 0 : index
    %c0_69 = arith.constant 0 : index
    %288 = vector.load %arg8[%c0_68, %c0_69] : memref<1x128xf32, #tpu.memory_space<vmem>>, vector<1x128xf32>
    %289 = vector.broadcast %288 : vector<1x128xf32> to vector<8x128xf32>
    %290 = arith.addf %287, %289 : vector<8x128xf32>
    %cst_70 = arith.constant 0.000000e+00 : f32
    %291 = vector.broadcast %cst_70 : f32 to vector<8x256xf32>
    %c0_71 = arith.constant 0 : index
    %c0_72 = arith.constant 0 : index
    %292 = vector.load %arg9[%c0_71, %c0_72] : memref<8x256xf32, #tpu.memory_space<vmem>>, vector<8x256xf32>
    tpu.vector_store %arg9[%c0_71, %c0_72], %291 {strides = array<i32>} : memref<8x256xf32, #tpu.memory_space<vmem>>, vector<8x256xf32>,
    %c0_73 = arith.constant 0 : index
    %c0_74 = arith.constant 0 : index
    %293 = vector.load %arg9[%c0_73, %c0_74] : memref<8x256xf32, #tpu.memory_space<vmem>>, vector<8x32xf32>
    tpu.vector_store %arg9[%c0_73, %c0_74], %284 {strides = array<i32>} : memref<8x256xf32, #tpu.memory_space<vmem>>, vector<8x32xf32>,
    %c0_75 = arith.constant 0 : index
    %c128 = arith.constant 128 : index
    %294 = vector.load %arg9[%c0_75, %c128] : memref<8x256xf32, #tpu.memory_space<vmem>>, vector<8x128xf32>
    tpu.vector_store %arg9[%c0_75, %c128], %290 {strides = array<i32>} : memref<8x256xf32, #tpu.memory_space<vmem>>, vector<8x128xf32>,
    return
  }
}

</mosaic_0001>

<bundles_post_ra>
// kernel: status_model_forward.1
= control target key start
LH: loop header
LB: loop body
LE: loop exit
PB: predicated region body
PF: predicated region fallthrough
CT: control target
= control target key end

     0   :  { %v962_v0 = vmov 0   ;;  %s963_s17 = smov 64   ;;  %v33_v8 = vlaneseq  ;;  %vm102_vm0 = vcmask 64512   ;;  %v964_v11 = vmov 0.0   ;;  %s1205_s1 = inlined_call_operand.vmem [shape: s32[64,1], index: 1, kind: input, shape index: {}]   ;;  %s1206_s4 = inlined_call_operand.vmem [shape: bf16[32,128], index: 4, kind: input, shape index: {}]   ;;  %s1207_s6 = inlined_call_operand.vmem [shape: f32[1,32], index: 6, kind: input, shape index: {}]   ;;  %s1208_s3 = inlined_call_operand.vmem [shape: f32[8,128], index: 3, kind: input, shape index: {}]   ;;  %s1209_s2 = inlined_call_operand.vmem [shape: bf16[16,128], index: 2, kind: input, shape index: {}]   ;;  %s1210_s0 = inlined_call_operand.vmem [shape: bf16[64,16], index: 0, kind: input, shape index: {}]   ;;  %s1211_s5 = inlined_call_operand.vmem [shape: f32[1,128], index: 5, kind: input, shape index: {}]   ;;  %s1212_s9 = inlined_call_operand.vmem [shape: f32[8,256], index: 9, kind: output, shape index: {}]   ;;  %s1213_s7 = inlined_call_operand.vmem [shape: bf16[32,128], index: 7, kind: input, shape index: {}]   ;;  %s1214_s8 = inlined_call_operand.vmem [shape: f32[1,128], index: 8, kind: input, shape index: {}]  }
   0x1   :  { %908 = vset.pattern.permute.xlu0 %v962_v0  ;;  %v42_v1 = vld [vmem:[%s1205_s1 + $0x38] sm:$0xff]  ;;  %v1022_v2 = vld [vmem:[%s1206_s4 + $0x8] sm:$0xff]  ;;  %909 = vset.pattern.permute.xlu1 %v962_v0  ;;  %v911_v3 = vld [vmem:[%s1207_s6] ss:$0 sm:$0xff]  ;;  %vm194_vm2 = vcmask 130048   ;;  %vm276_vm9 = vcmask 261120   ;;  %810 = vst [vmem:[%s1212_s9] sm:$0xff] %v964_v11 }
   0x2   :  { %65 = vperm.xlu0 %908, %v42_v1   ;;  %910 = vset.pattern.permute.xlu2 %v962_v0  ;;  %v1031_v4 = vld [vmem:[%s1206_s4] sm:$0xff]  ;;  %v1052_v9 = vand.u32 127, %v33_v8  ;;  %v895_v17 = vld [vmem:[%s1210_s0 + $0x8] sm:$0xff]  ;;  %v896_v22 = vld [vmem:[%s1210_s0 + $0x10] sm:$0xff] }
   0x3   :  { %286 = vmatpush.bf16.msra.mxu2 %v1022_v2  ;;  %351 = vmatpush.bf16.msra.mxu3 %v1022_v2  ;;  %v35_v5 = vld [vmem:[%s1205_s1] sm:$0xff]  ;;  %v36_v20 = vld [vmem:[%s1205_s1 + $0x8] sm:$0xff]  ;;  %v897_v23 = vld [vmem:[%s1210_s0 + $0x18] sm:$0xff] }
   0x4   :  { %313 = vrot.lane.b32.xlu1 %v911_v3, %s963_s17  ;;  %v101_v6 = vld [vmem:[%s1208_s3] sm:$0xff] }
   0x5   :  { %903 = vmatpush.msra.mxu1 %v101_v6  ;;  %142 = vmatpush.msra.mxu0 %v101_v6  ;;  %v898_v7 = vld [vmem:[%s1209_s2] sm:$0xff] }
   0x6   :  { %v894_v13 = vld [vmem:[%s1210_s0] sm:$0xff]  ;;  %s965_s0 = smov 96  }
   0x7   :  { %287 = vmatpush.bf16.msra.mxu2 %v1031_v4  ;;  %352 = vmatpush.bf16.msra.mxu3 %v1031_v4  ;;  %v1088_v25 = vld [vmem:[%s1211_s5] ss:$0 sm:$0xff] }
   0x8   :  { %214 = vmatpush.bf16.msrb.mxu1 %v898_v7 }
   0xa   :  { %44 = vperm.xlu0 %908, %v35_v5   ;;  %288 = vmatmul.bf16.vlgmr.msra.gmra.mxu2 %v962_v0 }
   0xb   :  { %413 = vmatpush.bf16.msrb.mxu2 %v1022_v2  ;;  %475 = vmatpush.bf16.msrb.mxu3 %v1022_v2 }
   0xf   :  { %414 = vmatpush.bf16.msrb.mxu2 %v1031_v4  ;;  %476 = vmatpush.bf16.msrb.mxu3 %v1031_v4 }
  0x13   :  { %537 = vmatpush.bf16.msra.mxu2 %v1022_v2 }
  0x17   :  { %538 = vmatpush.bf16.msra.mxu2 %v1031_v4 }
  0x74   :  { %v66_v10 = vpop.permute.xlu0 %65 }
  0x75   :  { %vm74_vm1 = vcmp.eq.s32.totalorder %v1052_v9, %v66_v10 }
  0x76   :  { %v829_v12 = vsel %vm74_vm1, 1.0, %v964_v11  ;;  %v1064_v16 = vpop.permute.xlu1 %313 }
  0x77   :  { %837 = vmatmul.msk.f32.vlgmr.msra.gmra.mxu1 %vm102_vm0, %v829_v12 }
  0x7c   :  { %v45_v14 = vpop.permute.xlu0 %44 }
  0x7d   :  { %vm67_vm3 = vcmp.eq.s32.totalorder %v1052_v9, %v45_v14 }
  0x7e   :  { %v822_v15 = vsel %vm67_vm3, 1.0, %v964_v11 }
  0x7f   :  { %830 = vmatmul.msk.f32.vlgmr.msra.gmra.mxu0 %vm102_vm0, %v822_v15  ;;  %858 = vmatmul.msk.bf16.vlgmr.msrb.gmra.mxu1 %vm194_vm2, %v894_v13 }
  0x8d   :  { %v289_v18 = vpop.f32.mrf.mxu2 }
  0x8e   :  { %v316_v19 = vadd.f32 %v1064_v16, %v289_v18 }
  0x8f   :  { %859 = vmatmul.msk.bf16.gmra.mxu1 %vm194_vm2, %v895_v17 }
  0x90   :  { %318 = vrot.lane.b32.xlu1 %v316_v19, %s963_s17 }
  0x95   :  { %v291_v21 = vpop.f32.mrf.mxu2 }
  0x98   :  { %47 = vperm.xlu1 %909, %v36_v20  }
  0x9f   :  { %860 = vmatmul.msk.bf16.gmra.mxu1 %vm194_vm2, %v896_v22  ;;  %v37_v22 = vld [vmem:[%s1205_s1 + $0x10] sm:$0xff] }
  0xaf   :  { %861 = vmatmul.msk.bf16.gmra.mxu1 %vm194_vm2, %v897_v23 }
  0xf4   :  { %v1083_v24 = vpop.f32.mrf.mxu1 }
  0xfc   :  { %v144_v26 = vpop.f32.mrf.mxu0  ;;  %v216_v27 = vpop.f32.mrf.mxu1 }
  0xfd   :  { %v217_v28 = vadd.f32 %v216_v27, %v144_v26 }
  0xff   :  { %v240_v29 = vadd.f32 %v1088_v25, %v217_v28 }
 0x101   :  { %v293_v30 = vadd.f32 %v289_v18, %v240_v29 }
 0x102   :  { %v319_v31 = vpop.permute.xlu1 %318 }
 0x103   :  { %v870_v32 = vmul.f32 -1.442695, %v293_v30 }
 0x104   :  { %v218_v62 = vpop.f32.mrf.mxu1 }
 0x105   :  { %914 = vpow2.f32 %v870_v32 }
 0x10a   :  { %v48_v33 = vpop.permute.xlu1 %47 }
 0x10b   :  { %v915_v34 = vpop.eup %914  ;;  %vm68_vm4 = vcmp.eq.s32.totalorder %v1052_v9, %v48_v33 }
 0x10c   :  { %v297_v35 = vadd.f32 1.0, %v915_v34  ;;  %v823_v36 = vsel %vm68_vm4, 1.0, %v964_v11 }
 0x10d   :  { %831 = vmatmul.msk.f32.gmra.mxu0 %vm102_vm0, %v823_v36 }
 0x10e   :  { %916 = vrcp.f32 %v297_v35  ;;  %v309_v40 = vand.u32 2147483648, %v297_v35  ;;  %v307_v42 = vand.u32 2147483647, %v297_v35  ;;  %vm303_vm6 = vweird.f32 %v297_v35 }
 0x110   :  { %v310_v44 = vor.u32 1.1754944e-38, %v309_v40  ;;  %vm308_vm8 = vcmp.eq.f32.partialorder %v307_v42, 8.507059e+37 }
 0x114   :  { %v917_v37 = vpop.eup %916 }
 0x115   :  { %v299_v38 = vmul.f32 %v917_v37, %v297_v35  ;;  %vm304_vm5 = vweird.f32 %v917_v37 }
 0x116   :  { %vm305_vm7 = vmor %vm303_vm6, %vm304_vm5 }
 0x117   :  { %v300_v39 = vsub.f32 1.0, %v299_v38 }
 0x119   :  { %v301_v41 = vmul.f32 %v917_v37, %v300_v39 }
 0x11b   :  { %v302_v43 = vadd.f32 %v917_v37, %v301_v41  ;;  %v221_v41 = vpop.f32.mrf.mxu1 }
 0x11d   :  { %v306_v45 = vsel %vm305_vm7, %v917_v37, %v302_v43 }
 0x11e   :  { %v311_v46 = vsel %vm308_vm8, %v310_v44, %v306_v45 }
 0x11f   :  { %v321_v47 = vmul.f32 %v319_v31, %v311_v46  ;;  %v328_v51 = vsub.f32 1.0, %v311_v46  ;;  %v334_v53 = vmul.f32 0.0, %v311_v46 }
 0x121   :  { %323 = vrot.lane.b32.xlu2 %v321_v47, %s963_s17 }
 0x17b   :  { %v324_v48 = vpop.permute.xlu2 %323 }
 0x17c   :  { %v326_v49 = vadd.f32 %v324_v48, %v240_v29 }
 0x17e   :  { %918 = vtanh.f32 %v326_v49 }
 0x184   :  { %v919_v50 = vpop.eup %918 }
 0x185   :  { %330 = vrot.lane.b32.xlu2 %v919_v50, %s965_s0 }
 0x18a   :  { %v147_v61 = vpop.f32.mrf.mxu0 }
 0x18b   :  { %v219_v63 = vadd.f32 %v218_v62, %v147_v61 }
 0x18d   :  { %v241_v0 = vadd.f32 %v1088_v25, %v219_v63 }
 0x1df   :  { %v331_v52 = vpop.permute.xlu2 %330 }
 0x1e0   :  { %v333_v54 = vmul.f32 %v331_v52, %v328_v51 }
 0x1e2   :  { %v335_v55 = vadd.f32 %v334_v53, %v333_v54 }
 0x1e4   :  { %v338_v56 = vpack.c.bf16 %v335_v55, %v335_v55 }
 0x1e6   :  { %340 = vrot.lane.b32.xlu0 %v338_v56, %s965_s0 }
 0x258   :  { %v341_v57 = vpop.permute.xlu0 %340 }
 0x259   :  { %871 = vmatmul.msk.bf16.vlgmr.msra.gmra.mxu3 %vm276_vm9, %v341_v57 }
 0x25a   :  { %599 = vmatpush.bf16.msra.mxu3 %v1022_v2 }
 0x25e   :  { %600 = vmatpush.bf16.msra.mxu3 %v1031_v4 }
 0x2dc   :  { %v354_v58 = vpop.f32.mrf.mxu3 }
 0x2dd   :  { %v378_v59 = vadd.f32 %v354_v58, %v1064_v16  ;;  %v358_v1 = vadd.f32 %v354_v58, %v241_v0 }
 0x2df   :  { %380 = vrot.lane.b32.xlu2 %v378_v59, %s963_s17  ;;  %v872_v3 = vmul.f32 -1.442695, %v358_v1 }
 0x2e1   :  { %920 = vpow2.f32 %v872_v3 }
 0x2e4   :  { %v356_v60 = vpop.f32.mrf.mxu3 }
 0x2e5   :  { %v38_v60 = vld [vmem:[%s1205_s1 + $0x18] sm:$0xff] }
 0x2e7   :  { %v921_v5 = vpop.eup %920 }
 0x2e8   :  { %v362_v6 = vadd.f32 1.0, %v921_v5 }
 0x2ea   :  { %922 = vrcp.f32 %v362_v6  ;;  %v374_v14 = vand.u32 2147483648, %v362_v6  ;;  %vm368_vm11 = vweird.f32 %v362_v6  ;;  %v372_v15 = vand.u32 2147483647, %v362_v6 }
 0x2ec   :  { %v375_v18 = vor.u32 1.1754944e-38, %v374_v14  ;;  %vm373_vm13 = vcmp.eq.f32.partialorder %v372_v15, 8.507059e+37 }
 0x2f0   :  { %v923_v7 = vpop.eup %922 }
 0x2f1   :  { %v364_v8 = vmul.f32 %v923_v7, %v362_v6  ;;  %vm369_vm10 = vweird.f32 %v923_v7 }
 0x2f2   :  { %vm370_vm12 = vmor %vm368_vm11, %vm369_vm10 }
 0x2f3   :  { %v365_v10 = vsub.f32 1.0, %v364_v8 }
 0x2f5   :  { %v366_v12 = vmul.f32 %v923_v7, %v365_v10 }
 0x2f7   :  { %v367_v13 = vadd.f32 %v923_v7, %v366_v12 }
 0x2f9   :  { %v371_v17 = vsel %vm370_vm12, %v923_v7, %v367_v13 }
 0x2fa   :  { %v376_v20 = vsel %vm373_vm13, %v375_v18, %v371_v17  ;;  %v223_v18 = vpop.f32.mrf.mxu1 }
 0x2fb   :  { %v390_v30 = vsub.f32 1.0, %v376_v20  ;;  %v396_v32 = vmul.f32 %v376_v20, %v335_v55 }
 0x339   :  { %v381_v19 = vpop.permute.xlu2 %380 }
 0x33a   :  { %v383_v21 = vmul.f32 %v381_v19, %v376_v20 }
 0x33c   :  { %385 = vrot.lane.b32.xlu0 %v383_v21, %s963_s17 }
 0x344   :  { %50 = vperm.xlu0 %908, %v37_v22  }
 0x3ae   :  { %v386_v23 = vpop.permute.xlu0 %385 }
 0x3af   :  { %v388_v26 = vadd.f32 %v386_v23, %v241_v0 }
 0x3b1   :  { %924 = vtanh.f32 %v388_v26 }
 0x3b6   :  { %v51_v27 = vpop.permute.xlu0 %50 }
 0x3b7   :  { %v925_v28 = vpop.eup %924  ;;  %vm69_vm14 = vcmp.eq.s32.totalorder %v1052_v9, %v51_v27 }
 0x3b8   :  { %v824_v29 = vsel %vm69_vm14, 1.0, %v964_v11  ;;  %392 = vrot.lane.b32.xlu1 %v925_v28, %s965_s0 }
 0x3b9   :  { %832 = vmatmul.msk.f32.gmra.mxu0 %vm102_vm0, %v824_v29 }
 0x42a   :  { %v393_v31 = vpop.permute.xlu1 %392 }
 0x42b   :  { %v395_v33 = vmul.f32 %v393_v31, %v390_v30 }
 0x42d   :  { %v397_v34 = vadd.f32 %v396_v32, %v395_v33 }
 0x42f   :  { %v400_v35 = vpack.c.bf16 %v397_v34, %v397_v34 }
 0x431   :  { %402 = vrot.lane.b32.xlu2 %v400_v35, %s965_s0 }
 0x436   :  { %v150_v40 = vpop.f32.mrf.mxu0 }
 0x437   :  { %v222_v42 = vadd.f32 %v221_v41, %v150_v40 }
 0x439   :  { %v242_v43 = vadd.f32 %v1088_v25, %v222_v42 }
 0x48b   :  { %v403_v36 = vpop.permute.xlu2 %402 }
 0x48c   :  { %873 = vmatmul.msk.bf16.vlgmr.msrb.gmra.mxu2 %vm276_vm9, %v403_v36 }
 0x48d   :  { %661 = vmatpush.bf16.msrb.mxu2 %v1022_v2 }
 0x491   :  { %662 = vmatpush.bf16.msrb.mxu2 %v1031_v4 }
 0x50f   :  { %v416_v37 = vpop.f32.mrf.mxu2 }
 0x510   :  { %v440_v38 = vadd.f32 %v416_v37, %v1064_v16  ;;  %v420_v44 = vadd.f32 %v416_v37, %v242_v43  ;;  %v39_v37 = vld [vmem:[%s1205_s1 + $0x20] sm:$0xff] }
 0x512   :  { %442 = vrot.lane.b32.xlu1 %v440_v38, %s963_s17  ;;  %v874_v45 = vmul.f32 -1.442695, %v420_v44 }
 0x514   :  { %926 = vpow2.f32 %v874_v45 }
 0x517   :  { %v418_v39 = vpop.f32.mrf.mxu2 }
 0x51a   :  { %v927_v46 = vpop.eup %926 }
 0x51b   :  { %v424_v47 = vadd.f32 1.0, %v927_v46 }
 0x51d   :  { %928 = vrcp.f32 %v424_v47  ;;  %v436_v53 = vand.u32 2147483648, %v424_v47  ;;  %vm430_vm1 = vweird.f32 %v424_v47  ;;  %v434_v54 = vand.u32 2147483647, %v424_v47 }
 0x51f   :  { %v437_v56 = vor.u32 1.1754944e-38, %v436_v53  ;;  %vm435_vm3 = vcmp.eq.f32.partialorder %v434_v54, 8.507059e+37  ;;  %v226_v54 = vpop.f32.mrf.mxu1 }
 0x523   :  { %v929_v48 = vpop.eup %928 }
 0x524   :  { %v426_v49 = vmul.f32 %v929_v48, %v424_v47  ;;  %vm431_vm15 = vweird.f32 %v929_v48 }
 0x525   :  { %vm432_vm2 = vmor %vm430_vm1, %vm431_vm15 }
 0x526   :  { %v427_v50 = vsub.f32 1.0, %v426_v49 }
 0x528   :  { %v428_v51 = vmul.f32 %v929_v48, %v427_v50 }
 0x52a   :  { %v429_v52 = vadd.f32 %v929_v48, %v428_v51 }
 0x52c   :  { %v433_v55 = vsel %vm432_vm2, %v929_v48, %v429_v52 }
 0x52d   :  { %v438_v58 = vsel %vm435_vm3, %v437_v56, %v433_v55 }
 0x52e   :  { %v452_v3 = vsub.f32 1.0, %v438_v58  ;;  %v458_v6 = vmul.f32 %v438_v58, %v397_v34 }
 0x584   :  { %v443_v57 = vpop.permute.xlu1 %442 }
 0x585   :  { %v445_v59 = vmul.f32 %v443_v57, %v438_v58 }
 0x587   :  { %447 = vrot.lane.b32.xlu2 %v445_v59, %s963_s17 }
 0x58f   :  { %53 = vperm.xlu2 %910, %v38_v60  }
 0x5e1   :  { %v448_v61 = vpop.permute.xlu2 %447 }
 0x5e2   :  { %v450_v62 = vadd.f32 %v448_v61, %v242_v43 }
 0x5e4   :  { %930 = vtanh.f32 %v450_v62 }
 0x5e9   :  { %v54_v63 = vpop.permute.xlu2 %53 }
 0x5ea   :  { %v931_v0 = vpop.eup %930  ;;  %vm70_vm4 = vcmp.eq.s32.totalorder %v1052_v9, %v54_v63 }
 0x5eb   :  { %v825_v1 = vsel %vm70_vm4, 1.0, %v964_v11  ;;  %454 = vrot.lane.b32.xlu0 %v931_v0, %s965_s0 }
 0x5ec   :  { %833 = vmatmul.msk.f32.gmra.mxu0 %vm102_vm0, %v825_v1 }
 0x65d   :  { %v455_v5 = vpop.permute.xlu0 %454 }
 0x65e   :  { %v457_v7 = vmul.f32 %v455_v5, %v452_v3 }
 0x660   :  { %v459_v8 = vadd.f32 %v458_v6, %v457_v7 }
 0x662   :  { %v462_v10 = vpack.c.bf16 %v459_v8, %v459_v8 }
 0x664   :  { %464 = vrot.lane.b32.xlu1 %v462_v10, %s965_s0 }
 0x669   :  { %v153_v17 = vpop.f32.mrf.mxu0 }
 0x66a   :  { %v224_v19 = vadd.f32 %v223_v18, %v153_v17 }
 0x66c   :  { %v243_v20 = vadd.f32 %v1088_v25, %v224_v19 }
 0x6d6   :  { %v465_v12 = vpop.permute.xlu1 %464 }
 0x6d7   :  { %875 = vmatmul.msk.bf16.vlgmr.msrb.gmra.mxu3 %vm276_vm9, %v465_v12 }
 0x6d8   :  { %723 = vmatpush.bf16.msrb.mxu3 %v1022_v2 }
 0x6dc   :  { %724 = vmatpush.bf16.msrb.mxu3 %v1031_v4 }
 0x75a   :  { %v478_v13 = vpop.f32.mrf.mxu3 }
 0x75b   :  { %v502_v14 = vadd.f32 %v478_v13, %v1064_v16  ;;  %v482_v21 = vadd.f32 %v478_v13, %v243_v20  ;;  %v40_v13 = vld [vmem:[%s1205_s1 + $0x28] sm:$0xff] }
 0x75d   :  { %504 = vrot.lane.b32.xlu0 %v502_v14, %s963_s17  ;;  %v876_v22 = vmul.f32 -1.442695, %v482_v21 }
 0x75f   :  { %932 = vpow2.f32 %v876_v22 }
 0x762   :  { %v480_v15 = vpop.f32.mrf.mxu3 }
 0x765   :  { %v933_v23 = vpop.eup %932 }
 0x766   :  { %v486_v26 = vadd.f32 1.0, %v933_v23 }
 0x768   :  { %934 = vrcp.f32 %v486_v26  ;;  %v498_v30 = vand.u32 2147483648, %v486_v26  ;;  %vm492_vm6 = vweird.f32 %v486_v26  ;;  %v496_v31 = vand.u32 2147483647, %v486_v26 }
 0x76a   :  { %v499_v33 = vor.u32 1.1754944e-38, %v498_v30  ;;  %vm497_vm8 = vcmp.eq.f32.partialorder %v496_v31, 8.507059e+37  ;;  %v228_v31 = vpop.f32.mrf.mxu1 }
 0x76e   :  { %v935_v2 = vpop.eup %934 }
 0x76f   :  { %v488_v27 = vmul.f32 %v935_v2, %v486_v26  ;;  %vm493_vm5 = vweird.f32 %v935_v2 }
 0x770   :  { %vm494_vm7 = vmor %vm492_vm6, %vm493_vm5 }
 0x771   :  { %v489_v4 = vsub.f32 1.0, %v488_v27 }
 0x773   :  { %v490_v28 = vmul.f32 %v935_v2, %v489_v4 }
 0x775   :  { %v491_v29 = vadd.f32 %v935_v2, %v490_v28 }
 0x777   :  { %v495_v32 = vsel %vm494_vm7, %v935_v2, %v491_v29 }
 0x778   :  { %v500_v35 = vsel %vm497_vm8, %v499_v33, %v495_v32 }
 0x779   :  { %v514_v43 = vsub.f32 1.0, %v500_v35  ;;  %v520_v45 = vmul.f32 %v500_v35, %v459_v8 }
 0x7cf   :  { %v505_v34 = vpop.permute.xlu0 %504 }
 0x7d0   :  { %v507_v36 = vmul.f32 %v505_v34, %v500_v35 }
 0x7d2   :  { %509 = vrot.lane.b32.xlu1 %v507_v36, %s963_s17 }
 0x7da   :  { %56 = vperm.xlu1 %909, %v39_v37  }
 0x844   :  { %v510_v38 = vpop.permute.xlu1 %509 }
 0x845   :  { %v512_v39 = vadd.f32 %v510_v38, %v243_v20 }
 0x847   :  { %936 = vtanh.f32 %v512_v39 }
 0x84c   :  { %v57_v40 = vpop.permute.xlu1 %56 }
 0x84d   :  { %v937_v41 = vpop.eup %936  ;;  %vm71_vm10 = vcmp.eq.s32.totalorder %v1052_v9, %v57_v40 }
 0x84e   :  { %v826_v42 = vsel %vm71_vm10, 1.0, %v964_v11  ;;  %516 = vrot.lane.b32.xlu2 %v937_v41, %s965_s0 }
 0x84f   :  { %834 = vmatmul.msk.f32.gmra.mxu0 %vm102_vm0, %v826_v42 }
 0x8a8   :  { %v517_v44 = vpop.permute.xlu2 %516 }
 0x8a9   :  { %v519_v46 = vmul.f32 %v517_v44, %v514_v43 }
 0x8ab   :  { %v521_v47 = vadd.f32 %v520_v45, %v519_v46 }
 0x8ad   :  { %v524_v48 = vpack.c.bf16 %v521_v47, %v521_v47 }
 0x8af   :  { %526 = vrot.lane.b32.xlu0 %v524_v48, %s965_s0 }
 0x8cc   :  { %v156_v53 = vpop.f32.mrf.mxu0 }
 0x8cd   :  { %v227_v55 = vadd.f32 %v226_v54, %v156_v53 }
 0x8cf   :  { %v244_v56 = vadd.f32 %v1088_v25, %v227_v55 }
 0x921   :  { %v527_v49 = vpop.permute.xlu0 %526 }
 0x922   :  { %877 = vmatmul.msk.bf16.vlgmr.msra.gmra.mxu2 %vm276_vm9, %v527_v49 }
 0x9a5   :  { %v540_v50 = vpop.f32.mrf.mxu2 }
 0x9a6   :  { %v564_v51 = vadd.f32 %v540_v50, %v1064_v16  ;;  %v544_v57 = vadd.f32 %v540_v50, %v244_v56  ;;  %v41_v50 = vld [vmem:[%s1205_s1 + $0x30] sm:$0xff] }
 0x9a8   :  { %566 = vrot.lane.b32.xlu2 %v564_v51, %s963_s17  ;;  %v878_v58 = vmul.f32 -1.442695, %v544_v57 }
 0x9aa   :  { %938 = vpow2.f32 %v878_v58 }
 0x9ad   :  { %v542_v52 = vpop.f32.mrf.mxu2 }
 0x9b0   :  { %v939_v59 = vpop.eup %938 }
 0x9b1   :  { %v548_v60 = vadd.f32 1.0, %v939_v59 }
 0x9b3   :  { %940 = vrcp.f32 %v548_v60  ;;  %v560_v3 = vand.u32 2147483648, %v548_v60  ;;  %vm554_vm12 = vweird.f32 %v548_v60  ;;  %v558_v5 = vand.u32 2147483647, %v548_v60 }
 0x9b5   :  { %v561_v7 = vor.u32 1.1754944e-38, %v560_v3  ;;  %vm559_vm14 = vcmp.eq.f32.partialorder %v558_v5, 8.507059e+37  ;;  %v231_v3 = vpop.f32.mrf.mxu1 }
 0x9b9   :  { %v941_v61 = vpop.eup %940 }
 0x9ba   :  { %v550_v62 = vmul.f32 %v941_v61, %v548_v60  ;;  %vm555_vm11 = vweird.f32 %v941_v61 }
 0x9bb   :  { %vm556_vm13 = vmor %vm554_vm12, %vm555_vm11 }
 0x9bc   :  { %v551_v63 = vsub.f32 1.0, %v550_v62 }
 0x9be   :  { %v552_v0 = vmul.f32 %v941_v61, %v551_v63 }
 0x9c0   :  { %v553_v1 = vadd.f32 %v941_v61, %v552_v0 }
 0x9c2   :  { %v557_v6 = vsel %vm556_vm13, %v941_v61, %v553_v1 }
 0x9c3   :  { %v562_v10 = vsel %vm559_vm14, %v561_v7, %v557_v6 }
 0x9c4   :  { %v576_v20 = vsub.f32 1.0, %v562_v10  ;;  %v582_v22 = vmul.f32 %v562_v10, %v521_v47 }
 0xa02   :  { %v567_v8 = vpop.permute.xlu2 %566 }
 0xa03   :  { %v569_v12 = vmul.f32 %v567_v8, %v562_v10 }
 0xa05   :  { %571 = vrot.lane.b32.xlu0 %v569_v12, %s963_s17 }
 0xa0d   :  { %59 = vperm.xlu0 %908, %v40_v13  }
 0xa77   :  { %v572_v14 = vpop.permute.xlu0 %571 }
 0xa78   :  { %v574_v15 = vadd.f32 %v572_v14, %v244_v56 }
 0xa7a   :  { %942 = vtanh.f32 %v574_v15 }
 0xa7f   :  { %v60_v17 = vpop.permute.xlu0 %59 }
 0xa80   :  { %v943_v18 = vpop.eup %942  ;;  %vm72_vm15 = vcmp.eq.s32.totalorder %v1052_v9, %v60_v17 }
 0xa81   :  { %v827_v19 = vsel %vm72_vm15, 1.0, %v964_v11  ;;  %578 = vrot.lane.b32.xlu1 %v943_v18, %s965_s0 }
 0xa82   :  { %835 = vmatmul.msk.f32.gmra.mxu0 %vm102_vm0, %v827_v19 }
 0xaf3   :  { %v579_v21 = vpop.permute.xlu1 %578 }
 0xaf4   :  { %v581_v23 = vmul.f32 %v579_v21, %v576_v20 }
 0xaf6   :  { %v583_v26 = vadd.f32 %v582_v22, %v581_v23 }
 0xaf8   :  { %v586_v2 = vpack.c.bf16 %v583_v26, %v583_v26 }
 0xafa   :  { %588 = vrot.lane.b32.xlu2 %v586_v2, %s965_s0 }
 0xaff   :  { %v159_v30 = vpop.f32.mrf.mxu0 }
 0xb00   :  { %v229_v32 = vadd.f32 %v228_v31, %v159_v30 }
 0xb02   :  { %v245_v33 = vadd.f32 %v1088_v25, %v229_v32 }
 0xb54   :  { %v589_v27 = vpop.permute.xlu2 %588 }
 0xb55   :  { %879 = vmatmul.msk.bf16.vlgmr.msra.gmra.mxu3 %vm276_vm9, %v589_v27 }
 0xbd8   :  { %v602_v4 = vpop.f32.mrf.mxu3 }
 0xbd9   :  { %v626_v28 = vadd.f32 %v602_v4, %v1064_v16  ;;  %v606_v34 = vadd.f32 %v602_v4, %v245_v33 }
 0xbdb   :  { %628 = vrot.lane.b32.xlu1 %v626_v28, %s963_s17  ;;  %v880_v35 = vmul.f32 -1.442695, %v606_v34 }
 0xbdd   :  { %944 = vpow2.f32 %v880_v35 }
 0xbe0   :  { %v604_v29 = vpop.f32.mrf.mxu3 }
 0xbe3   :  { %v945_v36 = vpop.eup %944 }
 0xbe4   :  { %v610_v37 = vadd.f32 1.0, %v945_v36 }
 0xbe6   :  { %946 = vrcp.f32 %v610_v37  ;;  %v622_v43 = vand.u32 2147483648, %v610_v37  ;;  %vm616_vm2 = vweird.f32 %v610_v37  ;;  %v620_v44 = vand.u32 2147483647, %v610_v37 }
 0xbe8   :  { %v623_v46 = vor.u32 1.1754944e-38, %v622_v43  ;;  %vm621_vm4 = vcmp.eq.f32.partialorder %v620_v44, 8.507059e+37 }
 0xbec   :  { %v947_v38 = vpop.eup %946 }
 0xbed   :  { %v612_v39 = vmul.f32 %v947_v38, %v610_v37  ;;  %vm617_vm1 = vweird.f32 %v947_v38 }
 0xbee   :  { %vm618_vm3 = vmor %vm616_vm2, %vm617_vm1 }
 0xbef   :  { %v613_v40 = vsub.f32 1.0, %v612_v39  ;;  %v233_v39 = vpop.f32.mrf.mxu1 }
 0xbf1   :  { %v614_v41 = vmul.f32 %v947_v38, %v613_v40  ;;  %v234_v40 = vadd.f32 %v233_v39, %v1083_v24 }
 0xbf3   :  { %v615_v42 = vadd.f32 %v947_v38, %v614_v41  ;;  %v247_v41 = vadd.f32 %v1088_v25, %v234_v40 }
 0xbf5   :  { %v619_v45 = vsel %vm618_vm3, %v947_v38, %v615_v42 }
 0xbf6   :  { %v624_v48 = vsel %vm621_vm4, %v623_v46, %v619_v45 }
 0xbf7   :  { %v638_v56 = vsub.f32 1.0, %v624_v48  ;;  %v644_v58 = vmul.f32 %v624_v48, %v583_v26 }
 0xc4d   :  { %v629_v47 = vpop.permute.xlu1 %628 }
 0xc4e   :  { %v631_v49 = vmul.f32 %v629_v47, %v624_v48 }
 0xc50   :  { %633 = vrot.lane.b32.xlu2 %v631_v49, %s963_s17 }
 0xc58   :  { %62 = vperm.xlu2 %910, %v41_v50  }
 0xcaa   :  { %v634_v51 = vpop.permute.xlu2 %633 }
 0xcab   :  { %v636_v52 = vadd.f32 %v634_v51, %v245_v33 }
 0xcad   :  { %948 = vtanh.f32 %v636_v52 }
 0xcb2   :  { %v63_v53 = vpop.permute.xlu2 %62 }
 0xcb3   :  { %v949_v54 = vpop.eup %948  ;;  %vm73_vm5 = vcmp.eq.s32.totalorder %v1052_v9, %v63_v53 }
 0xcb4   :  { %v828_v55 = vsel %vm73_vm5, 1.0, %v964_v11  ;;  %640 = vrot.lane.b32.xlu0 %v949_v54, %s965_s0 }
 0xcb5   :  { %836 = vmatmul.msk.f32.gmra.mxu0 %vm102_vm0, %v828_v55 }
 0xd26   :  { %v641_v57 = vpop.permute.xlu0 %640 }
 0xd27   :  { %v643_v59 = vmul.f32 %v641_v57, %v638_v56 }
 0xd29   :  { %v645_v60 = vadd.f32 %v644_v58, %v643_v59  ;;  %v902_v58 = vld [vmem:[%s1213_s7 + $0x8] sm:$0xff]  ;;  %v901_v59 = vld [vmem:[%s1213_s7] sm:$0xff] }
 0xd2a   :  { %803 = vmatpush.bf16.msrb.mxu0 %v902_v58 }
 0xd2b   :  { %v648_v61 = vpack.c.bf16 %v645_v60, %v645_v60 }
 0xd2d   :  { %650 = vrot.lane.b32.xlu1 %v648_v61, %s965_s0 }
 0xd2e   :  { %804 = vmatpush.bf16.msrb.mxu0 %v901_v59 }
 0xd32   :  { %v162_v1 = vpop.f32.mrf.mxu0 }
 0xd33   :  { %v232_v5 = vadd.f32 %v231_v3, %v162_v1  ;;  %v913_v3 = vld [vmem:[%s1214_s8] ss:$0 sm:$0xff] }
 0xd35   :  { %v246_v6 = vadd.f32 %v1088_v25, %v232_v5 }
 0xd9f   :  { %v651_v62 = vpop.permute.xlu1 %650 }
 0xda0   :  { %881 = vmatmul.msk.bf16.vlgmr.msrb.gmra.mxu2 %vm276_vm9, %v651_v62 }
 0xe23   :  { %v664_v63 = vpop.f32.mrf.mxu2 }
 0xe24   :  { %v688_v9 = vadd.f32 %v664_v63, %v1064_v16  ;;  %v668_v7 = vadd.f32 %v664_v63, %v246_v6 }
 0xe26   :  { %690 = vrot.lane.b32.xlu0 %v688_v9, %s963_s17  ;;  %v882_v8 = vmul.f32 -1.442695, %v668_v7 }
 0xe28   :  { %950 = vpow2.f32 %v882_v8 }
 0xe2b   :  { %v666_v0 = vpop.f32.mrf.mxu2 }
 0xe2e   :  { %v951_v10 = vpop.eup %950 }
 0xe2f   :  { %v672_v12 = vadd.f32 1.0, %v951_v10 }
 0xe31   :  { %952 = vrcp.f32 %v672_v12  ;;  %v684_v19 = vand.u32 2147483648, %v672_v12  ;;  %vm678_vm6 = vweird.f32 %v672_v12  ;;  %v682_v20 = vand.u32 2147483647, %v672_v12 }
 0xe33   :  { %v685_v22 = vor.u32 1.1754944e-38, %v684_v19  ;;  %vm683_vm8 = vcmp.eq.f32.partialorder %v682_v20, 8.507059e+37 }
 0xe37   :  { %v953_v13 = vpop.eup %952 }
 0xe38   :  { %v674_v14 = vmul.f32 %v953_v13, %v672_v12  ;;  %vm679_vm0 = vweird.f32 %v953_v13 }
 0xe39   :  { %vm680_vm7 = vmor %vm678_vm6, %vm679_vm0 }
 0xe3a   :  { %v675_v15 = vsub.f32 1.0, %v674_v14 }
 0xe3c   :  { %v676_v17 = vmul.f32 %v953_v13, %v675_v15 }
 0xe3e   :  { %v677_v18 = vadd.f32 %v953_v13, %v676_v17 }
 0xe40   :  { %v681_v21 = vsel %vm680_vm7, %v953_v13, %v677_v18 }
 0xe41   :  { %v686_v26 = vsel %vm683_vm8, %v685_v22, %v681_v21 }
 0xe42   :  { %v700_v29 = vsub.f32 1.0, %v686_v26  ;;  %v706_v31 = vmul.f32 %v686_v26, %v645_v60 }
 0xe98   :  { %v691_v23 = vpop.permute.xlu0 %690 }
 0xe99   :  { %v693_v2 = vmul.f32 %v691_v23, %v686_v26 }
 0xe9b   :  { %695 = vrot.lane.b32.xlu1 %v693_v2, %s963_s17 }
 0xf0d   :  { %v696_v27 = vpop.permute.xlu1 %695 }
 0xf0e   :  { %v698_v4 = vadd.f32 %v696_v27, %v246_v6 }
 0xf10   :  { %954 = vtanh.f32 %v698_v4 }
 0xf16   :  { %v955_v28 = vpop.eup %954 }
 0xf17   :  { %702 = vrot.lane.b32.xlu2 %v955_v28, %s965_s0 }
 0xf71   :  { %v703_v30 = vpop.permute.xlu2 %702 }
 0xf72   :  { %v705_v32 = vmul.f32 %v703_v30, %v700_v29 }
 0xf74   :  { %v707_v33 = vadd.f32 %v706_v31, %v705_v32 }
 0xf76   :  { %v710_v34 = vpack.c.bf16 %v707_v33, %v707_v33 }
 0xf78   :  { %712 = vrot.lane.b32.xlu0 %v710_v34, %s965_s0 }
 0xfea   :  { %v713_v35 = vpop.permute.xlu0 %712 }
 0xfeb   :  { %883 = vmatmul.msk.bf16.vlgmr.msrb.gmra.mxu3 %vm276_vm9, %v713_v35 }
0x106e   :  { %v726_v36 = vpop.f32.mrf.mxu3 }
0x106f   :  { %v750_v37 = vadd.f32 %v726_v36, %v1064_v16  ;;  %v730_v42 = vadd.f32 %v726_v36, %v247_v41 }
0x1071   :  { %752 = vrot.lane.b32.xlu1 %v750_v37, %s963_s17  ;;  %v884_v43 = vmul.f32 -1.442695, %v730_v42 }
0x1073   :  { %956 = vpow2.f32 %v884_v43 }
0x1076   :  { %v728_v38 = vpop.f32.mrf.mxu3 }
0x1079   :  { %v957_v44 = vpop.eup %956 }
0x107a   :  { %v734_v45 = vadd.f32 1.0, %v957_v44 }
0x107c   :  { %958 = vrcp.f32 %v734_v45  ;;  %v746_v16 = vand.u32 2147483648, %v734_v45  ;;  %vm740_vm11 = vweird.f32 %v734_v45  ;;  %v744_v51 = vand.u32 2147483647, %v734_v45 }
0x107e   :  { %v747_v24 = vor.u32 1.1754944e-38, %v746_v16  ;;  %vm745_vm13 = vcmp.eq.f32.partialorder %v744_v51, 8.507059e+37 }
0x1082   :  { %v959_v46 = vpop.eup %958 }
0x1083   :  { %v736_v47 = vmul.f32 %v959_v46, %v734_v45  ;;  %vm741_vm10 = vweird.f32 %v959_v46 }
0x1084   :  { %vm742_vm12 = vmor %vm740_vm11, %vm741_vm10 }
0x1085   :  { %v737_v48 = vsub.f32 1.0, %v736_v47 }
0x1087   :  { %v738_v49 = vmul.f32 %v959_v46, %v737_v48 }
0x1089   :  { %v739_v50 = vadd.f32 %v959_v46, %v738_v49 }
0x108b   :  { %v743_v52 = vsel %vm742_vm12, %v959_v46, %v739_v50 }
0x108c   :  { %v748_v53 = vsel %vm745_vm13, %v747_v24, %v743_v52 }
0x108d   :  { %v762_v60 = vsub.f32 1.0, %v748_v53  ;;  %v768_v62 = vmul.f32 %v748_v53, %v707_v33 }
0x10e3   :  { %v753_v25 = vpop.permute.xlu1 %752 }
0x10e4   :  { %v755_v54 = vmul.f32 %v753_v25, %v748_v53 }
0x10e6   :  { %757 = vrot.lane.b32.xlu2 %v755_v54, %s963_s17 }
0x1140   :  { %v758_v55 = vpop.permute.xlu2 %757 }
0x1141   :  { %v760_v56 = vadd.f32 %v758_v55, %v247_v41 }
0x1143   :  { %960 = vtanh.f32 %v760_v56 }
0x1149   :  { %v961_v57 = vpop.eup %960 }
0x114a   :  { %764 = vrot.lane.b32.xlu0 %v961_v57, %s965_s0 }
0x11bc   :  { %v765_v61 = vpop.permute.xlu0 %764 }
0x11bd   :  { %v767_v63 = vmul.f32 %v765_v61, %v762_v60 }
0x11bf   :  { %v769_v9 = vadd.f32 %v768_v62, %v767_v63 }
0x11c1   :  { %813 = vrot.lane.b32.xlu2 %v769_v9, %s965_s0  ;;  %v770_v11 = vpack.c.bf16 %v769_v9, %v769_v9 }
0x11c3   :  { %780 = vrot.lane.b32.xlu1 %v770_v11, %s965_s0 }
0x121b   :  { %v814_v0 = vpop.permute.xlu2 %813 }
0x121c   :  { %816 = vst.msk [vmem:[%s1212_s9] sm:$0xff] %vm276_vm9, %v814_v0 }
0x1235   :  { %v781_v1 = vpop.permute.xlu1 %780 }
0x1236   :  { %893 = vmatmul.msk.bf16.vlgmr.msrb.gmra.mxu0 %vm276_vm9, %v781_v1 }
0x12b3   :  { %v806_v5 = vpop.f32.mrf.mxu0 }
0x12b4   :  { %v807_v6 = vadd.f32 %v913_v3, %v806_v5 }
0x12b6   :  { %817 = vst [vmem:[%s1212_s9 + $0x8] sm:$0xff] %v807_v6 }
0x12bb   :  { %v808_v7 = vpop.f32.mrf.mxu0 }

</bundles_post_ra>
